<compile_context>
chip_gen: v5e
topology: v5e:2x2
jax: 0.10.0
libtpu: 0.0.40
codegen_flags: <defaults>
</compile_context>

<pallas_src>
import math
from functools import partial

import numpy as np
import jax
import jax.numpy as jnp
from jax.experimental import pallas as pl
from jax.experimental.pallas import tpu as pltpu

# ---- static configuration of the synthetic upstream/featurizer/downstream ----
MIN_SECOND = 0.05
SAMPLE_RATE = 16000

BATCH = 2
STRIDE = 128          # downsample rate of every layer (frame hop)
FRAME = STRIDE        # frame window == hop  ->  n_frames = ceil(T / STRIDE)
NUM_LAYERS = 4        # number of upstream hidden-state layers (same H / stride)
HIDDEN = 32           # hidden size of every layer
OUT_SIZE = 16         # downstream.output_size
OUT_PAD = 128         # lane-dense padded output width (multiple of 128)
WAV_SAMPLES = 2048    # waveform samples in the example (>= MIN_SECOND*SR)

MAX_ROW_TILE = 512    # row-tile size once B*S grows beyond a single block


def _round_up(x, m):
    return (x + m - 1) // m * m


def _udm_kernel(frames_ref, w0_ref, wl_ref, nw_ref, wd_ref, bd_ref, out_ref):
    """Fused upstream + featurizer weighted-sum + downstream linear (one row tile).

    frames_ref : (Rt, FRAME)          VMEM bf16  row tile of framed waveform
    w0_ref     : (FRAME, H)           VMEM bf16  frame -> hidden projection
    wl_ref     : (H, (L-1)*H)         VMEM bf16  lane-packed per-layer hidden transforms
    nw_ref     : (L,)                 SMEM f32   softmax-normalized featurizer weights
    wd_ref     : (H, OUT_PAD)         VMEM bf16  downstream weight, zero-padded lanes
    bd_ref     : (1, OUT_PAD)         VMEM f32   downstream bias, zero-padded lanes
    out_ref    : (Rt, OUT_PAD)        VMEM f32   lane-dense output tile
    """
    frames = frames_ref[...]
    wl = wl_ref[...]
    # upstream layer 0 (feature extractor): bf16 MXU, f32 accumulation
    h = jnp.dot(frames, w0_ref[...], preferred_element_type=jnp.float32)   # (Rt, H) f32
    # featurizer weighted sum, accumulated layer by layer (f32 VPU)
    acc = nw_ref[0] * h
    for i in range(NUM_LAYERS - 1):
        w_i = wl[:, i * HIDDEN:(i + 1) * HIDDEN]                           # static slice
        h = jnp.tanh(jnp.dot(h.astype(jnp.bfloat16), w_i,
                             preferred_element_type=jnp.float32))
        acc = acc + nw_ref[i + 1] * h
    # downstream per-frame linear (lane-dense, unmasked full-width store)
    out = jnp.dot(acc.astype(jnp.bfloat16), wd_ref[...],
                  preferred_element_type=jnp.float32) + bd_ref[...]
    out_ref[...] = out


def _build_pallas_call(rows_pad, row_tile):
    grid = (rows_pad // row_tile,)
    wl_cols = (NUM_LAYERS - 1) * HIDDEN
    flops = 2 * rows_pad * (FRAME * HIDDEN
                            + (NUM_LAYERS - 1) * HIDDEN * HIDDEN
                            + HIDDEN * OUT_PAD)
    transcendentals = (NUM_LAYERS - 1) * rows_pad * HIDDEN
    bytes_accessed = (2 * (rows_pad * FRAME + FRAME * HIDDEN
                           + HIDDEN * wl_cols + HIDDEN * OUT_PAD)          # bf16 operands
                      + 4 * (NUM_LAYERS + OUT_PAD + rows_pad * OUT_PAD))   # f32 operands
    return pl.pallas_call(
        _udm_kernel,
        out_shape=jax.ShapeDtypeStruct((rows_pad, OUT_PAD), jnp.float32),
        grid=grid,
        in_specs=[
            pl.BlockSpec((row_tile, FRAME), lambda i: (i, 0)),      # frames (bf16), tiled
            pl.BlockSpec((FRAME, HIDDEN), lambda i: (0, 0)),        # w0 (bf16), resident
            pl.BlockSpec((HIDDEN, wl_cols), lambda i: (0, 0)),      # wl packed (bf16)
            pl.BlockSpec(memory_space=pltpu.MemorySpace.SMEM),      # norm weights (f32)
            pl.BlockSpec((HIDDEN, OUT_PAD), lambda i: (0, 0)),      # wd (bf16), lane-padded
            pl.BlockSpec((1, OUT_PAD), lambda i: (0, 0)),           # bd (f32), lane-padded
        ],
        out_specs=pl.BlockSpec((row_tile, OUT_PAD), lambda i: (i, 0)),
        compiler_params=pltpu.CompilerParams(
            dimension_semantics=("parallel",)),   # shards row tiles across v7x's 2 TCs
        cost_estimate=pl.CostEstimate(
            flops=flops,
            transcendentals=transcendentals,
            bytes_accessed=bytes_accessed,
        ),
    )


def init_params(key):
    k0, k1, k2, k3 = jax.random.split(key, 4)
    w0 = jax.random.normal(k0, (FRAME, HIDDEN), jnp.float32) * math.sqrt(
        2.0 / (FRAME + HIDDEN))                       # xavier-ish
    wl = jax.random.normal(k1, (NUM_LAYERS - 1, HIDDEN, HIDDEN), jnp.float32) * math.sqrt(
        2.0 / (2 * HIDDEN))
    feat_w = jnp.zeros((NUM_LAYERS,), jnp.float32)    # Featurizer: nn.Parameter(torch.zeros(L))
    wd = jax.random.normal(k2, (HIDDEN, OUT_SIZE), jnp.float32) * math.sqrt(
        2.0 / (HIDDEN + OUT_SIZE))
    bd = jax.random.normal(k3, (1, OUT_SIZE), jnp.float32) * 0.01
    return dict(w0=w0, wl=wl, feat_w=feat_w, wd=wd, bd=bd)


def prepare_inference_params(params):
    """One-time param prep: featurizer softmax, lane-packed/padded layouts, bf16 casts.

    Doing this once (instead of per forward call) removes the per-call XLA prologue that
    previously surrounded the microsecond-scale custom call.
    """
    nw = jax.nn.softmax(params["feat_w"], axis=-1)                           # (L,) f32
    # (L-1, H, H) -> lane-packed (H, (L-1)*H) so each layer is a static lane slice.
    wl2d = jnp.transpose(params["wl"], (1, 0, 2)).reshape(
        HIDDEN, (NUM_LAYERS - 1) * HIDDEN)
    wd_pad = jnp.zeros((HIDDEN, OUT_PAD), jnp.float32).at[:, :OUT_SIZE].set(params["wd"])
    bd_pad = jnp.zeros((1, OUT_PAD), jnp.float32).at[:, :OUT_SIZE].set(params["bd"])
    return dict(
        nw=jax.device_put(nw),
        w0=jax.device_put(params["w0"].astype(jnp.bfloat16)),
        wl2d=jax.device_put(wl2d.astype(jnp.bfloat16)),
        wd_pad=jax.device_put(wd_pad.astype(jnp.bfloat16)),
        bd_pad=jax.device_put(bd_pad),
    )


@partial(jax.jit, static_argnames=("n_frames",))
def _forward_device(wavs, nw, w0, wl2d, wd_pad, bd_pad, *, n_frames):
    """On-device framing (pure reshape since hop == frame), padding, cast, kernel call."""
    batch, t = wavs.shape
    want_t = n_frames * STRIDE
    if t < want_t:
        wavs = jnp.pad(wavs, ((0, 0), (0, want_t - t)))
    elif t > want_t:
        wavs = wavs[:, :want_t]
    rows = batch * n_frames
    rows_pad = _round_up(rows, 16)                    # bf16 sublane packing = 16 rows
    if rows_pad > MAX_ROW_TILE:
        rows_pad = _round_up(rows_pad, MAX_ROW_TILE)
    row_tile = min(rows_pad, MAX_ROW_TILE)
    frames = wavs.reshape(rows, FRAME).astype(jnp.bfloat16)
    if rows_pad > rows:
        frames = jnp.pad(frames, ((0, rows_pad - rows), (0, 0)))
    out_flat = _build_pallas_call(rows_pad, row_tile)(
        frames, w0, wl2d, nw, wd_pad, bd_pad)
    # un-pad lanes/rows and restore (B, S, O)
    return out_flat[:rows, :OUT_SIZE].reshape(batch, n_frames, OUT_SIZE)


def upstream_downstream_forward(wavs, wavs_len, infer_params):
    """Mirrors UpstreamDownstreamModel.forward: (wav, wav_len) -> (out, out_len)."""
    wavs = jnp.asarray(wavs, jnp.float32)
    if wavs.ndim == 3:                 # (B, T, 1) -> (B, T)
        wavs = wavs[..., 0]
    # Only the tiny per-item length vector is read on host (shape metadata for the
    # data-dependent trim, exactly as s3prl does); the waveform stays on device.
    original_wavs_len = np.asarray(jax.device_get(wavs_len)).astype(np.int64)
    wavs_len_h = original_wavs_len.copy()

    # S3PRLUpstream.forward: MIN_SECOND zero-padding branch (padding itself is on-device
    # via jnp.pad-to-want_t below; only the length bookkeeping happens here).
    if int(original_wavs_len.max()) < MIN_SECOND * SAMPLE_RATE:
        padded = int(MIN_SECOND * SAMPLE_RATE) - int(original_wavs_len.max())
        wavs_len_h = wavs_len_h + padded

    max_wav_len = int(wavs_len_h.max())
    n_frames = -(-max_wav_len // STRIDE)   # expected_max_h_len = len(range(0, max_wav_len, stride))
    # (_match_length is a no-op here: the synthetic upstream emits exactly
    #  expected_max_h_len frames per layer.)

    out = _forward_device(wavs, infer_params["nw"], infer_params["w0"],
                          infer_params["wl2d"], infer_params["wd_pad"],
                          infer_params["bd_pad"], n_frames=n_frames)

    # valid length per layer (all layers share the stride), then trim to max(h_len)
    h_len = (original_wavs_len - 1) // STRIDE + 1
    out = out[:, : int(h_len.max()), :]
    return out, jnp.asarray(h_len.astype(np.int32))


def _reference(frames, norm_w, params):
    """Pure NumPy f32 reference of the fused forward pass."""
    frames = np.asarray(frames, np.float32)
    w0 = np.asarray(params["w0"])
    wl = np.asarray(params["wl"])
    wd = np.asarray(params["wd"])
    bd = np.asarray(params["bd"])
    nw = np.asarray(norm_w)
    h = frames @ w0
    acc = nw[0] * h
    for i in range(NUM_LAYERS - 1):
        h = np.tanh(h @ wl[i])
        acc = acc + nw[i + 1] * h
    return acc @ wd + bd


if __name__ == "__main__":
    key = jax.random.PRNGKey(0)
    pkey, wkey = jax.random.split(key)
    params = init_params(pkey)
    infer = prepare_inference_params(params)

    wavs = jax.random.normal(wkey, (BATCH, WAV_SAMPLES), jnp.float32)
    wavs_len = jnp.array([1536, 2048], dtype=jnp.int32)

    out, out_len = upstream_downstream_forward(wavs, wavs_len, infer)
    out = jax.block_until_ready(out)
    out_len = jax.block_until_ready(out_len)

    # correctness check against a pure-NumPy f32 reference (kernel uses bf16 matmul
    # inputs with f32 accumulation; well within the stated tolerance)
    n_frames = -(-int(np.asarray(wavs_len).max()) // STRIDE)
    frames_np = np.asarray(wavs, np.float32).reshape(BATCH, n_frames, FRAME)
    norm_w = jax.nn.softmax(params["feat_w"], axis=-1)
    ref = _reference(frames_np, norm_w, params)[:, : out.shape[1], :]

    np.testing.assert_allclose(np.asarray(out), ref, rtol=2e-2, atol=2e-2)
    expected_len = (np.asarray(wavs_len, np.int64) - 1) // STRIDE + 1
    assert np.array_equal(np.asarray(out_len), expected_len.astype(np.int32))

    # TODO(synk): hub checkpoint loading / real hubert conv+transformer upstream and the
    # normalize=True layer-norm branch are not modeled; this keeps the module's
    # frame->layers->featurizer->downstream dataflow and length semantics.
    print("KERNEL_OK")
</pallas_src>

<mosaic_0001>
module attributes {stable_mosaic.version = 11 : i64} {
  func.func @_udm_kernel(%arg0: i32, %arg1: memref<32x128xbf16, #tpu.memory_space<vmem>>, %arg2: memref<128x32xbf16, #tpu.memory_space<vmem>>, %arg3: memref<32x96xbf16, #tpu.memory_space<vmem>>, %arg4: memref<4xf32, #tpu.memory_space<smem>>, %arg5: memref<32x128xbf16, #tpu.memory_space<vmem>>, %arg6: memref<1x128xf32, #tpu.memory_space<vmem>>, %arg7: memref<32x128xf32, #tpu.memory_space<vmem>>) attributes {dimension_semantics = [#tpu.dimension_semantics<parallel>], iteration_bounds = array<i64: 1>, scalar_prefetch = 0 : i64, scratch_operands = 0 : i64, tpu.core_type = #tpu.core_type<tc>, window_params = [{transform_indices = @transform_0, window_bounds = array<i64: 32, 128>}, {pipeline_mode = #tpu.pipeline_mode<synchronous>, transform_indices = @transform_1, window_bounds = array<i64: 128, 32>}, {pipeline_mode = #tpu.pipeline_mode<synchronous>, transform_indices = @transform_2, window_bounds = array<i64: 32, 96>}, {transform_indices = @transform_3, window_bounds = array<i64: 4>}, {pipeline_mode = #tpu.pipeline_mode<synchronous>, transform_indices = @transform_4, window_bounds = array<i64: 32, 128>}, {pipeline_mode = #tpu.pipeline_mode<synchronous>, transform_indices = @transform_5, window_bounds = array<i64: 1, 128>}, {transform_indices = @transform_6, window_bounds = array<i64: 32, 128>}]} {
    %c0 = arith.constant 0 : index
    %c0_0 = arith.constant 0 : index
    %0 = vector.load %arg1[%c0, %c0_0] : memref<32x128xbf16, #tpu.memory_space<vmem>>, vector<32x128xbf16>
    %c0_1 = arith.constant 0 : index
    %c0_2 = arith.constant 0 : index
    %1 = vector.load %arg3[%c0_1, %c0_2] : memref<32x96xbf16, #tpu.memory_space<vmem>>, vector<32x96xbf16>
    %c0_3 = arith.constant 0 : index
    %c0_4 = arith.constant 0 : index
    %2 = vector.load %arg2[%c0_3, %c0_4] : memref<128x32xbf16, #tpu.memory_space<vmem>>, vector<128x32xbf16>
    %cst = arith.constant dense<0.000000e+00> : vector<32x32xf32>
    %3 = tpu.matmul %0, %2, %cst {dimension_numbers = #tpu.dot_dimension_numbers<[1], [0], [0], [1], [0, 0, 1, 1], [], []>} : vector<32x128xbf16>, vector<128x32xbf16>, vector<32x32xf32> -> vector<32x32xf32>
    %c0_5 = arith.constant 0 : index
    %4 = memref.load %arg4[%c0_5] : memref<4xf32, #tpu.memory_space<smem>>
    %5 = vector.broadcast %4 : f32 to vector<32x32xf32>
    %6 = arith.mulf %5, %3 : vector<32x32xf32>
    %7 = vector.extract_strided_slice %1 {offsets = [0, 0], sizes = [32, 32], strides = [1, 1]} : vector<32x96xbf16> to vector<32x32xbf16>
    %8 = arith.truncf %3 : vector<32x32xf32> to vector<32x32xbf16>
    %cst_6 = arith.constant dense<0.000000e+00> : vector<32x32xf32>
    %9 = tpu.matmul %8, %7, %cst_6 {dimension_numbers = #tpu.dot_dimension_numbers<[1], [0], [0], [1], [0, 0, 1, 1], [], []>} : vector<32x32xbf16>, vector<32x32xbf16>, vector<32x32xf32> -> vector<32x32xf32>
    %10 = math.tanh %9 : vector<32x32xf32>
    %c1 = arith.constant 1 : index
    %11 = memref.load %arg4[%c1] : memref<4xf32, #tpu.memory_space<smem>>
    %12 = vector.broadcast %11 : f32 to vector<32x32xf32>
    %13 = arith.mulf %12, %10 : vector<32x32xf32>
    %14 = arith.addf %6, %13 : vector<32x32xf32>
    %15 = vector.extract_strided_slice %1 {offsets = [0, 32], sizes = [32, 32], strides = [1, 1]} : vector<32x96xbf16> to vector<32x32xbf16>
    %16 = arith.truncf %10 : vector<32x32xf32> to vector<32x32xbf16>
    %cst_7 = arith.constant dense<0.000000e+00> : vector<32x32xf32>
    %17 = tpu.matmul %16, %15, %cst_7 {dimension_numbers = #tpu.dot_dimension_numbers<[1], [0], [0], [1], [0, 0, 1, 1], [], []>} : vector<32x32xbf16>, vector<32x32xbf16>, vector<32x32xf32> -> vector<32x32xf32>
    %18 = math.tanh %17 : vector<32x32xf32>
    %c2 = arith.constant 2 : index
    %19 = memref.load %arg4[%c2] : memref<4xf32, #tpu.memory_space<smem>>
    %20 = vector.broadcast %19 : f32 to vector<32x32xf32>
    %21 = arith.mulf %20, %18 : vector<32x32xf32>
    %22 = arith.addf %14, %21 : vector<32x32xf32>
    %23 = vector.extract_strided_slice %1 {offsets = [0, 64], sizes = [32, 32], strides = [1, 1]} : vector<32x96xbf16> to vector<32x32xbf16>
    %24 = arith.truncf %18 : vector<32x32xf32> to vector<32x32xbf16>
    %cst_8 = arith.constant dense<0.000000e+00> : vector<32x32xf32>
    %25 = tpu.matmul %24, %23, %cst_8 {dimension_numbers = #tpu.dot_dimension_numbers<[1], [0], [0], [1], [0, 0, 1, 1], [], []>} : vector<32x32xbf16>, vector<32x32xbf16>, vector<32x32xf32> -> vector<32x32xf32>
    %26 = math.tanh %25 : vector<32x32xf32>
    %c3 = arith.constant 3 : index
    %27 = memref.load %arg4[%c3] : memref<4xf32, #tpu.memory_space<smem>>
    %28 = vector.broadcast %27 : f32 to vector<32x32xf32>
    %29 = arith.mulf %28, %26 : vector<32x32xf32>
    %30 = arith.addf %22, %29 : vector<32x32xf32>
    %31 = arith.truncf %30 : vector<32x32xf32> to vector<32x32xbf16>
    %c0_9 = arith.constant 0 : index
    %c0_10 = arith.constant 0 : index
    %32 = vector.load %arg5[%c0_9, %c0_10] : memref<32x128xbf16, #tpu.memory_space<vmem>>, vector<32x128xbf16>
    %cst_11 = arith.constant dense<0.000000e+00> : vector<32x128xf32>
    %33 = tpu.matmul %31, %32, %cst_11 {dimension_numbers = #tpu.dot_dimension_numbers<[1], [0], [0], [1], [0, 0, 1, 1], [], []>} : vector<32x32xbf16>, vector<32x128xbf16>, vector<32x128xf32> -> vector<32x128xf32>
    %c0_12 = arith.constant 0 : index
    %c0_13 = arith.constant 0 : index
    %34 = vector.load %arg6[%c0_12, %c0_13] : memref<1x128xf32, #tpu.memory_space<vmem>>, vector<1x128xf32>
    %35 = vector.broadcast %34 : vector<1x128xf32> to vector<32x128xf32>
    %36 = arith.addf %33, %35 : vector<32x128xf32>
    %c0_14 = arith.constant 0 : index
    %c0_15 = arith.constant 0 : index
    %37 = vector.load %arg7[%c0_14, %c0_15] : memref<32x128xf32, #tpu.memory_space<vmem>>, vector<32x128xf32>
    tpu.vector_store %arg7[%c0_14, %c0_15], %36 {strides = array<i32>} : memref<32x128xf32, #tpu.memory_space<vmem>>, vector<32x128xf32>,
    return
  }
  func.func @transform_0(%arg0: i32) -> (i32, i32) {
    %c0_i32 = arith.constant 0 : i32
    %c0_i32_0 = arith.constant 0 : i32
    return %arg0, %c0_i32 : i32, i32
  }
  func.func @transform_1(%arg0: i32) -> (i32, i32) {
    %c0_i32 = arith.constant 0 : i32
    %c0_i32_0 = arith.constant 0 : i32
    %c0_i32_1 = arith.constant 0 : i32
    return %c0_i32, %c0_i32_0 : i32, i32
  }
  func.func @transform_2(%arg0: i32) -> (i32, i32) {
    %c0_i32 = arith.constant 0 : i32
    %c0_i32_0 = arith.constant 0 : i32
    %c0_i32_1 = arith.constant 0 : i32
    return %c0_i32, %c0_i32_0 : i32, i32
  }
  func.func @transform_3(%arg0: i32) -> i32 {
    %c0_i32 = arith.constant 0 : i32
    %c0_i32_0 = arith.constant 0 : i32
    return %c0_i32 : i32
  }
  func.func @transform_4(%arg0: i32) -> (i32, i32) {
    %c0_i32 = arith.constant 0 : i32
    %c0_i32_0 = arith.constant 0 : i32
    %c0_i32_1 = arith.constant 0 : i32
    return %c0_i32, %c0_i32_0 : i32, i32
  }
  func.func @transform_5(%arg0: i32) -> (i32, i32) {
    %c0_i32 = arith.constant 0 : i32
    %c0_i32_0 = arith.constant 0 : i32
    %c0_i32_1 = arith.constant 0 : i32
    return %c0_i32, %c0_i32_0 : i32, i32
  }
  func.func @transform_6(%arg0: i32) -> (i32, i32) {
    %c0_i32 = arith.constant 0 : i32
    %c0_i32_0 = arith.constant 0 : i32
    return %arg0, %c0_i32 : i32, i32
  }
}

</mosaic_0001>

<bundles_post_ra>
// kernel: _forward_device.1
= control target key start
LH: loop header
LB: loop body
LE: loop exit
PB: predicated region body
PF: predicated region fallthrough
CT: control target
= control target key end

     0   :  { %11 = vsyncpa [#allocation4], 0  ;;  %s619_s0 = inlined_call_operand.vmem [shape: bf16[32,128], index: 0, kind: input, shape index: {}]   ;;  %s620_s1 = inlined_call_operand.vmem [shape: bf16[128,32], index: 1, kind: input, shape index: {}]   ;;  %s621_s2 = inlined_call_operand.vmem [shape: bf16[32,96], index: 2, kind: input, shape index: {}]   ;;  %s622_s3 = inlined_call_operand.vmem [shape: f32[4], index: 3, kind: input, shape index: {}]   ;;  %s623_s4 = inlined_call_operand.vmem [shape: bf16[32,128], index: 4, kind: input, shape index: {}]   ;;  %s624_s5 = inlined_call_operand.vmem [shape: f32[1,128], index: 5, kind: input, shape index: {}]   ;;  %s625_s6 = inlined_call_operand.hbm [shape: f32[32,128], index: 6, kind: output, shape index: {}]  }
   0x1   :  { %12 = vsyncpa [#allocation3], 0  ;;  %s24_s23 = sshll.u32 %s622_s3, 4  ;;  %s519_s24 = smov [#allocation2]   ;;  %s25_s23 = int_to_ptr.vmem [resolvable:$true] %s24_s23 }
   0x2   :  { %27 = dma.vmem_to_smem %s25_s23, 16, %s519_s24, [#allocation4]  }
   0x3   :  { %515 = dma.done.wait [#allocation4], 16  }
   0x4   :  { %516 = vsyncadd [#allocation4], 4294967280 }
   0x5   :  { %36 = sfence }
   0x6   :  { %v443_v0 = vld [vmem:[%s620_s1 + $0x38] sm:$0xff]  ;;  %v442_v1 = vld [vmem:[%s620_s1 + $0x30] sm:$0xff]  ;;  %v441_v2 = vld [vmem:[%s620_s1 + $0x28] sm:$0xff]  ;;  %s520_s22 = smov 96   ;;  %vm161_vm0 = vcmask 261120   ;;  %s415_s24 = sld [smem:[#allocation2 + $0x1]] }
   0x7   :  { %122 = vmatpush.bf16.msra.mxu0 %v443_v0  ;;  %v440_v3 = vld [vmem:[%s620_s1 + $0x20] sm:$0xff]  ;;  %v439_v4 = vld [vmem:[%s620_s1 + $0x18] sm:$0xff]  ;;  %v438_v5 = vld [vmem:[%s620_s1 + $0x10] sm:$0xff]  ;;  %s418_s25 = sld [smem:[#allocation2 + $0x2]]  ;;  %s522_s7 = smov [#allocation5]  }
   0x8   :  { %v437_v6 = vld [vmem:[%s620_s1 + $0x8] sm:$0xff]  ;;  %v436_v7 = vld [vmem:[%s620_s1] sm:$0xff]  ;;  %s421_s30 = sld [smem:[#allocation2 + $0x3]]  ;;  %s350_s8 = sshll.u32 %s522_s7, 4  ;;  %s351_s8 = int_to_ptr.vmem [resolvable:$true] %s350_s8 }
   0x9   :  { %v432_v8 = vld [vmem:[%s619_s0] sm:$0xff]  ;;  %v433_v9 = vld [vmem:[%s619_s0 + $0x8] sm:$0xff]  ;;  %s521_s0 = smov 64   ;;  %s352_s11 = sshll.u32 %s625_s6, 4  ;;  %s353_s11 = int_to_ptr.hbm [resolvable:$true] %s352_s11 }
   0xa   :  { %v435_v10 = vld [vmem:[%s621_s2 + $0x8] sm:$0xff]  ;;  %v434_v11 = vld [vmem:[%s621_s2] sm:$0xff]  ;;  %s141_s2 = sld [smem:[#allocation2]]  ;;  %s524_s12 = smov 8  }
   0xb   :  { %123 = vmatpush.bf16.msra.mxu0 %v442_v1  ;;  %174 = vmatpush.bf16.msra.mxu1 %v435_v10  ;;  %v445_v1 = vld [vmem:[%s623_s4 + $0x8] sm:$0xff] }
   0xc   :  { %446 = vmatpush.bf16.msra.mxu2 %v435_v10  ;;  %205 = vrot.lane.b32.xlu0 %v435_v10, %s520_s22  ;;  %v192_v22 = vstv %s415_s24 }
   0xd   :  { %252 = vrot.lane.b32.xlu1 %v435_v10, %s521_s0  ;;  %v239_v47 = vstv %s418_s25 }
   0xf   :  { %124 = vmatpush.bf16.msra.mxu0 %v441_v2  ;;  %175 = vmatpush.bf16.msra.mxu1 %v434_v11  ;;  %v444_v2 = vld [vmem:[%s623_s4] sm:$0xff] }
  0x10   :  { %447 = vmatpush.bf16.msra.mxu2 %v434_v11  ;;  %v142_v21 = vstv %s141_s2 }
  0x13   :  { %125 = vmatpush.bf16.msra.mxu0 %v440_v3  ;;  %329 = vmatpush.bf16.msrb.mxu1 %v445_v1 }
  0x14   :  { %203 = vrot.lane.b32.xlu0 %v434_v11, %s520_s22 }
  0x15   :  { %250 = vrot.lane.b32.xlu1 %v434_v11, %s521_s0 }
  0x17   :  { %126 = vmatpush.bf16.msra.mxu0 %v439_v4  ;;  %330 = vmatpush.bf16.msrb.mxu1 %v444_v2 }
  0x1b   :  { %127 = vmatpush.bf16.msra.mxu0 %v438_v5 }
  0x1f   :  { %128 = vmatpush.bf16.msra.mxu0 %v437_v6  ;;  %v286_v6 = vstv %s421_s30 }
  0x23   :  { %129 = vmatpush.bf16.msra.mxu0 %v436_v7 }
  0x26   :  { %130 = vmatmul.bf16.vlgmr.msra.gmra.mxu0 %v432_v8 }
  0x36   :  { %135 = vmatmul.bf16.gmra.mxu0 %v433_v9 }
  0x7e   :  { %v206_v18 = vpop.permute.xlu0 %205 }
  0x7f   :  { %221 = vmatpush.bf16.msrb.mxu2 %v206_v18  ;;  %v253_v44 = vpop.permute.xlu1 %252 }
  0x80   :  { %268 = vmatpush.bf16.msra.mxu3 %v253_v44 }
  0x86   :  { %v204_v19 = vpop.permute.xlu0 %203 }
  0x87   :  { %222 = vmatpush.bf16.msrb.mxu2 %v204_v19  ;;  %v251_v45 = vpop.permute.xlu1 %250 }
  0x88   :  { %269 = vmatpush.bf16.msra.mxu3 %v251_v45 }
  0xa3   :  { %v131_v12 = vpop.f32.mrf.mxu0 }
  0xa4   :  { %v143_v24 = vmul.f32 %v142_v21, %v131_v12 }
  0xab   :  { %v133_v13 = vpop.f32.mrf.mxu0 }
  0xac   :  { %v147_v14 = vpack.c.bf16 %v133_v13, %v131_v12  ;;  %v144_v29 = vmul.f32 %v142_v21, %v133_v13 }
  0xae   :  { %413 = vmatmul.msk.bf16.vlgmr.msra.gmra.mxu1 %vm161_vm0, %v147_v14 }
  0xb3   :  { %v136_v15 = vpop.f32.mrf.mxu0 }
  0xb4   :  { %v145_v35 = vmul.f32 %v142_v21, %v136_v15 }
  0xbb   :  { %v138_v16 = vpop.f32.mrf.mxu0 }
  0xbc   :  { %v148_v17 = vpack.c.bf16 %v138_v16, %v136_v15  ;;  %v146_v40 = vmul.f32 %v142_v21, %v138_v16 }
  0xbe   :  { %414 = vmatmul.msk.bf16.vlgmr.msra.gmra.mxu2 %vm161_vm0, %v148_v17 }
 0x12b   :  { %v177_v20 = vpop.f32.mrf.mxu1 }
 0x12c   :  { %455 = vtanh.f32 %v177_v20 }
 0x132   :  { %v456_v23 = vpop.eup %455 }
 0x133   :  { %v193_v25 = vmul.f32 %v456_v23, %v192_v22  ;;  %v179_v26 = vpop.f32.mrf.mxu1 }
 0x134   :  { %457 = vtanh.f32 %v179_v26 }
 0x135   :  { %v197_v27 = vadd.f32 %v193_v25, %v143_v24 }
 0x13a   :  { %v458_v28 = vpop.eup %457 }
 0x13b   :  { %v194_v30 = vmul.f32 %v458_v28, %v192_v22  ;;  %v201_v31 = vpack.c.bf16 %v458_v28, %v456_v23 }
 0x13d   :  { %v198_v32 = vadd.f32 %v194_v30, %v144_v29  ;;  %416 = vmatmul.msk.bf16.vlgmr.msrb.gmra.mxu2 %vm161_vm0, %v201_v31 }
 0x141   :  { %v182_v33 = vpop.f32.mrf.mxu2 }
 0x142   :  { %459 = vtanh.f32 %v182_v33 }
 0x148   :  { %v460_v34 = vpop.eup %459 }
 0x149   :  { %v195_v36 = vmul.f32 %v460_v34, %v192_v22  ;;  %v184_v37 = vpop.f32.mrf.mxu2 }
 0x14a   :  { %461 = vtanh.f32 %v184_v37 }
 0x14b   :  { %v199_v38 = vadd.f32 %v195_v36, %v145_v35 }
 0x150   :  { %v462_v39 = vpop.eup %461 }
 0x151   :  { %v196_v41 = vmul.f32 %v462_v39, %v192_v22  ;;  %v202_v42 = vpack.c.bf16 %v462_v39, %v460_v34  ;;  %v454_v22 = vld [vmem:[%s624_s5] ss:$0 sm:$0xff]  ;;  %s523_s5 = smov 128  }
 0x153   :  { %v200_v43 = vadd.f32 %v196_v41, %v146_v40  ;;  %417 = vmatmul.msk.bf16.gmra.mxu2 %vm161_vm0, %v202_v42 }
 0x1c0   :  { %v224_v46 = vpop.f32.mrf.mxu2 }
 0x1c1   :  { %463 = vtanh.f32 %v224_v46 }
 0x1c7   :  { %v464_v48 = vpop.eup %463 }
 0x1c8   :  { %v240_v49 = vmul.f32 %v464_v48, %v239_v47  ;;  %v226_v50 = vpop.f32.mrf.mxu2 }
 0x1c9   :  { %465 = vtanh.f32 %v226_v50 }
 0x1ca   :  { %v244_v51 = vadd.f32 %v240_v49, %v197_v27 }
 0x1cf   :  { %v466_v52 = vpop.eup %465 }
 0x1d0   :  { %v241_v53 = vmul.f32 %v466_v52, %v239_v47  ;;  %v248_v54 = vpack.c.bf16 %v466_v52, %v464_v48 }
 0x1d2   :  { %v245_v55 = vadd.f32 %v241_v53, %v198_v32  ;;  %419 = vmatmul.msk.bf16.vlgmr.msra.gmra.mxu3 %vm161_vm0, %v248_v54 }
 0x1d6   :  { %v229_v56 = vpop.f32.mrf.mxu2 }
 0x1d7   :  { %467 = vtanh.f32 %v229_v56 }
 0x1dd   :  { %v468_v57 = vpop.eup %467 }
 0x1de   :  { %v242_v58 = vmul.f32 %v468_v57, %v239_v47  ;;  %v231_v59 = vpop.f32.mrf.mxu2 }
 0x1df   :  { %469 = vtanh.f32 %v231_v59 }
 0x1e0   :  { %v246_v60 = vadd.f32 %v242_v58, %v199_v38 }
 0x1e5   :  { %v470_v61 = vpop.eup %469 }
 0x1e6   :  { %v243_v62 = vmul.f32 %v470_v61, %v239_v47  ;;  %v249_v63 = vpack.c.bf16 %v470_v61, %v468_v57 }
 0x1e8   :  { %420 = vmatmul.msk.bf16.gmra.mxu3 %vm161_vm0, %v249_v63  ;;  %v247_v0 = vadd.f32 %v243_v62, %v200_v43 }
 0x255   :  { %v271_v3 = vpop.f32.mrf.mxu3 }
 0x256   :  { %471 = vtanh.f32 %v271_v3 }
 0x25c   :  { %v472_v5 = vpop.eup %471 }
 0x25d   :  { %v273_v4 = vpop.f32.mrf.mxu3  ;;  %v287_v7 = vmul.f32 %v472_v5, %v286_v6 }
 0x25e   :  { %473 = vtanh.f32 %v273_v4 }
 0x25f   :  { %v291_v10 = vadd.f32 %v287_v7, %v244_v51 }
 0x264   :  { %v474_v8 = vpop.eup %473 }
 0x265   :  { %v288_v9 = vmul.f32 %v474_v8, %v286_v6 }
 0x267   :  { %v292_v11 = vadd.f32 %v288_v9, %v245_v55 }
 0x269   :  { %v295_v12 = vpack.c.bf16 %v292_v11, %v291_v10 }
 0x26b   :  { %v276_v13 = vpop.f32.mrf.mxu3  ;;  %430 = vmatmul.msk.bf16.vlgmr.msrb.gmra.mxu1 %vm161_vm0, %v295_v12 }
 0x26c   :  { %475 = vtanh.f32 %v276_v13 }
 0x272   :  { %v476_v15 = vpop.eup %475 }
 0x273   :  { %v278_v14 = vpop.f32.mrf.mxu3  ;;  %v289_v16 = vmul.f32 %v476_v15, %v286_v6 }
 0x274   :  { %477 = vtanh.f32 %v278_v14 }
 0x275   :  { %v293_v19 = vadd.f32 %v289_v16, %v246_v60 }
 0x27a   :  { %v478_v17 = vpop.eup %477 }
 0x27b   :  { %v290_v18 = vmul.f32 %v478_v17, %v286_v6 }
 0x27d   :  { %v294_v20 = vadd.f32 %v290_v18, %v247_v0 }
 0x27f   :  { %v296_v21 = vpack.c.bf16 %v294_v20, %v293_v19 }
 0x281   :  { %431 = vmatmul.msk.bf16.gmra.mxu1 %vm161_vm0, %v296_v21 }
 0x2e8   :  { %v332_v23 = vpop.f32.mrf.mxu1 }
 0x2e9   :  { %v333_v24 = vadd.f32 %v454_v22, %v332_v23 }
 0x2eb   :  { %342 = vst [vmem:[#allocation5] sm:$0xff] %v333_v24 }
 0x2f0   :  { %v334_v25 = vpop.f32.mrf.mxu1 }
 0x2f1   :  { %v335_v26 = vadd.f32 %v454_v22, %v334_v25 }
 0x2f3   :  { %343 = vst [vmem:[#allocation5 + $0x8] sm:$0xff] %v335_v26 }
 0x2fe   :  { %v337_v27 = vpop.f32.mrf.mxu1 }
 0x2ff   :  { %v338_v28 = vadd.f32 %v454_v22, %v337_v27 }
 0x301   :  { %344 = vst [vmem:[#allocation5 + $0x10] sm:$0xff] %v338_v28 }
 0x306   :  { %v339_v29 = vpop.f32.mrf.mxu1 }
 0x307   :  { %v340_v30 = vadd.f32 %v454_v22, %v339_v29 }
 0x309   :  { %345 = vst [vmem:[#allocation5 + $0x18] sm:$0xff] %v340_v30 }
 0x30a   :  { %358 = dma.vmem_to_hbm [thread:$0]  %s351_s8, 512, %s353_s11, [#allocation3], %s523_s5, %s523_s5, %s524_s12  }
 0x30b   :  { %517 = dma.done.wait [#allocation3], 512  }
 0x30c   :  { %518 = vsyncadd [#allocation3], 4294966784 }
 0x30d   :  { %363 = vsyncpa [#allocation3], 1 }
 0x30e   :  { %364 = vsyncpa [#allocation4], 1 }

</bundles_post_ra>
